<compile_context>
chip_gen: v5e
topology: v5e:2x2
jax: 0.10.0
libtpu: 0.0.40
codegen_flags: <defaults>
</compile_context>

<pallas_src>
import jax
import jax.numpy as jnp
from jax.experimental import pallas as pl
from jax.experimental.pallas import tpu as pltpu


def _round_up(x, m):
    return ((x + m - 1) // m) * m


def _sublane(dtype):
    """Rows per sublane tile for this dtype (f32: 8, bf16: 16, int8: 32)."""
    return 8 * (4 // max(1, jnp.dtype(dtype).itemsize))


def _make_highway_kernel(resident_weights):
    """Build the kernel; `resident_weights` selects full-stack vs per-layer refs."""

    def kernel(x_ref, w_ref, b_ref, o_ref, acc_ref):
        # x_ref:   (tn, D)      input tile (DMA'd once per row tile)
        # w_ref:   (L, D, 2D)   resident fused [W_t | W_c] stack
        #          or (D, 2D)   per-layer streamed block
        # b_ref:   (L, 1, 2D) / (1, 2D) fused [b_t | b_c]
        # o_ref:   (tn, D)      HBM output tile (written once, last layer)
        # acc_ref: (tn, D) f32  layer-resident activation accumulator
        d = x_ref.shape[-1]
        layer = pl.program_id(1)
        num_layers = pl.num_programs(1)

        # Seed the f32 accumulator directly from the input on the first layer
        # (no store-then-reload through the output buffer).
        @pl.when(layer == 0)
        def _():
            acc_ref[...] = x_ref[...].astype(jnp.float32)

        x32 = acc_ref[...]
        if resident_weights:
            w = w_ref[layer]          # (D, 2D) dynamic slice of resident stack
            b = b_ref[layer]          # (1, 2D)
        else:
            w = w_ref[...]
            b = b_ref[...]

        # One fused matmul yields both gate pre-activations: (tn, 2D).
        # MXU inputs in the weight dtype (bf16-friendly), f32 accumulation.
        y = (jnp.dot(x32.astype(w.dtype), w, preferred_element_type=jnp.float32)
             + b.astype(jnp.float32))
        t = jax.nn.sigmoid(y[:, :d])      # transform_gate -> sigmoid
        h = jnp.maximum(y[:, d:], 0.0)    # carry_gate     -> relu (nonlinear path)
        # TODO(synk): training-mode dropout on h not implemented (eval = identity).
        # Exact formula from the PyTorch module: x = t*h + (1 - t)*x.
        acc_ref[...] = t * h + (1.0 - t) * x32

        @pl.when(layer == num_layers - 1)
        def _():
            o_ref[...] = acc_ref[...].astype(o_ref.dtype)

    return kernel


def highway_pallas_2d(x2d, w_stack, b_stack, *, tile_n=512):
    """x2d: (N, D); w_stack: (L, D, 2D); b_stack: (L, 1, 2D)."""
    N, D = x2d.shape
    L = w_stack.shape[0]
    w_bytes_per_elem = jnp.dtype(w_stack.dtype).itemsize
    act_bytes = jnp.dtype(x2d.dtype).itemsize

    # --- row tiling: dtype-aware sublane rounding + >=2 tiles for megacore ---
    sub = _sublane(x2d.dtype)
    n_rows = _round_up(N, sub)
    half = _round_up((n_rows + 1) // 2, sub)
    tn = max(sub, min(tile_n, half if n_rows > sub else n_rows))
    n_pad = _round_up(N, tn)
    if n_pad != N:
        x2d = jnp.pad(x2d, ((0, n_pad - N), (0, 0)))
    row_tiles = n_pad // tn

    # --- weight residency decision ------------------------------------------
    stack_bytes = (L * D * 2 * D + L * 2 * D) * w_bytes_per_elem
    resident = stack_bytes <= 16 * 2 ** 20  # hold whole stack in VMEM if small

    if resident:
        # Constant block index -> fetched once, shared across all row tiles.
        w_spec = pl.BlockSpec((L, D, 2 * D), lambda i, l: (0, 0, 0))
        b_spec = pl.BlockSpec((L, 1, 2 * D), lambda i, l: (0, 0, 0))
        weight_traffic = stack_bytes
        weight_vmem = stack_bytes
    else:
        # Fallback: stream one layer's fused weight per step (double-buffered).
        w_spec = pl.BlockSpec((None, D, 2 * D), lambda i, l: (l, 0, 0))
        b_spec = pl.BlockSpec((None, 1, 2 * D), lambda i, l: (l, 0, 0))
        weight_traffic = row_tiles * stack_bytes
        weight_vmem = 2 * (D * 2 * D + 2 * D) * w_bytes_per_elem

    # --- explicit VMEM budget (re-derived for v7x 64 MiB / v5e 16 MiB scoped) -
    vmem_needed = (2 * weight_vmem                   # weight buffers (+ headroom)
                   + 2 * 2 * tn * D * act_bytes      # x + out tiles, double-buffered
                   + tn * D * 4                      # f32 accumulator scratch
                   + tn * 2 * D * 4)                 # fused (tn, 2D) matmul result
    vmem_limit = int(min(max(2 * vmem_needed, 16 * 2 ** 20), 64 * 2 ** 20))

    cost = pl.CostEstimate(
        flops=2 * n_pad * D * 2 * D * L,
        transcendentals=n_pad * D * L,
        bytes_accessed=2 * n_pad * D * act_bytes + weight_traffic,
    )

    out = pl.pallas_call(
        _make_highway_kernel(resident),
        out_shape=jax.ShapeDtypeStruct((n_pad, D), x2d.dtype),
        grid=(row_tiles, L),
        in_specs=[
            # activation tile: constant along the layer axis (DMA'd once/tile)
            pl.BlockSpec((tn, D), lambda i, l: (i, 0)),
            w_spec,
            b_spec,
        ],
        # constant block index along the layer axis; written once at last layer
        out_specs=pl.BlockSpec((tn, D), lambda i, l: (i, 0)),
        scratch_shapes=[pltpu.VMEM((tn, D), jnp.float32)],
        compiler_params=pltpu.CompilerParams(
            dimension_semantics=("parallel", "arbitrary"),
            vmem_limit_bytes=vmem_limit,
        ),
        cost_estimate=cost,
    )(x2d, w_stack, b_stack)

    return out[:N] if n_pad != N else out


@jax.jit
def highway_forward(x, w_stack, b_stack):
    """x: (..., input_size). Fused weights: (L, D, 2D) / (L, 1, 2D)."""
    orig_shape = x.shape
    D = orig_shape[-1]
    x2d = x.reshape(-1, D)
    out = highway_pallas_2d(x2d, w_stack, b_stack)
    return out.reshape(orig_shape)


def init_highway_params(key, input_size, num_layers=1, dtype=jnp.float32):
    """Mimics nn.Linear init (uniform +-1/sqrt(fan_in)); packs [Wt|Wc], [bt|bc].

    Weights are stored pre-transposed as (in, out) so the kernel computes
    y = x @ W + b directly. Use dtype=jnp.bfloat16 for bf16 weights (the
    kernel keeps gate math and the activation chain in f32).
    """
    bound = 1.0 / (input_size ** 0.5)
    ws, bs = [], []
    for _ in range(num_layers):
        key, k1, k2, k3, k4 = jax.random.split(key, 5)
        w_t = jax.random.uniform(k1, (input_size, input_size), dtype, -bound, bound)
        b_t = jax.random.uniform(k2, (input_size,), dtype, -bound, bound)
        w_c = jax.random.uniform(k3, (input_size, input_size), dtype, -bound, bound)
        b_c = jax.random.uniform(k4, (input_size,), dtype, -bound, bound)
        ws.append(jnp.concatenate([w_t, w_c], axis=1))        # (D, 2D)
        bs.append(jnp.concatenate([b_t, b_c])[None, :])       # (1, 2D)
    return jnp.stack(ws), jnp.stack(bs)                       # (L,D,2D), (L,1,2D)


def highway_reference(x, w_stack, b_stack):
    """Plain-JAX reference of the PyTorch forward (eval-mode dropout)."""
    orig_shape = x.shape
    D = orig_shape[-1]
    x2d = x.reshape(-1, D).astype(jnp.float32)
    L = w_stack.shape[0]
    for i in range(L):
        w = w_stack[i].astype(jnp.float32)
        b = b_stack[i].astype(jnp.float32)
        y = x2d @ w + b
        t = jax.nn.sigmoid(y[:, :D])
        h = jnp.maximum(y[:, D:], 0.0)
        x2d = t * h + (1.0 - t) * x2d
    return x2d.reshape(orig_shape).astype(x.dtype)


if __name__ == "__main__":
    input_size = 128          # lane-dense feature dim (multiple of 128)
    num_layers = 2
    batch, seq = 2, 8

    key = jax.random.PRNGKey(0)
    key, kx, kp = jax.random.split(key, 3)
    x = jax.random.normal(kx, (batch, seq, input_size), dtype=jnp.float32)
    w_stack, b_stack = init_highway_params(kp, input_size, num_layers=num_layers)

    out = highway_forward(x, w_stack, b_stack)
    out = jax.block_until_ready(out)

    ref = highway_reference(x, w_stack, b_stack)
    assert out.shape == x.shape
    assert jnp.allclose(out, ref, atol=1e-5, rtol=1e-5), "mismatch vs reference"

    print("KERNEL_OK")
</pallas_src>

<mosaic_0001>
module attributes {stable_mosaic.version = 11 : i64} {
  func.func @kernel(%arg0: i32, %arg1: i32, %arg2: memref<8x128xf32, #tpu.memory_space<vmem>>, %arg3: memref<2x128x256xf32, #tpu.memory_space<vmem>>, %arg4: memref<2x1x256xf32, #tpu.memory_space<vmem>>, %arg5: memref<8x128xf32, #tpu.memory_space<vmem>>, %arg6: memref<8x128xf32, #tpu.memory_space<vmem>>) attributes {dimension_semantics = [#tpu.dimension_semantics<parallel>, #tpu.dimension_semantics<arbitrary>], iteration_bounds = array<i64: 2, 2>, scalar_prefetch = 0 : i64, scratch_operands = 1 : i64, tpu.core_type = #tpu.core_type<tc>, window_params = [{transform_indices = @transform_0, window_bounds = array<i64: 8, 128>}, {pipeline_mode = #tpu.pipeline_mode<synchronous>, transform_indices = @transform_1, window_bounds = array<i64: 2, 128, 256>}, {pipeline_mode = #tpu.pipeline_mode<synchronous>, transform_indices = @transform_2, window_bounds = array<i64: 2, 1, 256>}, {transform_indices = @transform_3, window_bounds = array<i64: 8, 128>}]} {
    %c0_i32 = arith.constant 0 : i32
    %0 = arith.cmpi eq, %arg1, %c0_i32 : i32
    %1 = arith.extui %0 : i1 to i32
    %c0_i32_0 = arith.constant 0 : i32
    %2 = arith.cmpi ne, %1, %c0_i32_0 : i32
    scf.if %2 {
      %c0_12 = arith.constant 0 : index
      %c0_13 = arith.constant 0 : index
      %31 = vector.load %arg2[%c0_12, %c0_13] : memref<8x128xf32, #tpu.memory_space<vmem>>, vector<8x128xf32>
      %c0_14 = arith.constant 0 : index
      %c0_15 = arith.constant 0 : index
      %32 = vector.load %arg6[%c0_14, %c0_15] : memref<8x128xf32, #tpu.memory_space<vmem>>, vector<8x128xf32>
      tpu.vector_store %arg6[%c0_14, %c0_15], %31 {strides = array<i32>} : memref<8x128xf32, #tpu.memory_space<vmem>>, vector<8x128xf32>,
    } else {
    }
    %c0 = arith.constant 0 : index
    %c0_1 = arith.constant 0 : index
    %3 = vector.load %arg6[%c0, %c0_1] : memref<8x128xf32, #tpu.memory_space<vmem>>, vector<8x128xf32>
    %4 = arith.index_cast %arg1 : i32 to index
    %c0_2 = arith.constant 0 : index
    %c0_3 = arith.constant 0 : index
    %5 = vector.load %arg3[%4, %c0_2, %c0_3] : memref<2x128x256xf32, #tpu.memory_space<vmem>>, vector<1x128x256xf32>
    %6 = vector.shape_cast %5 : vector<1x128x256xf32> to vector<128x256xf32>
    %7 = arith.index_cast %arg1 : i32 to index
    %c0_4 = arith.constant 0 : index
    %c0_5 = arith.constant 0 : index
    %8 = vector.load %arg4[%7, %c0_4, %c0_5] : memref<2x1x256xf32, #tpu.memory_space<vmem>>, vector<1x1x256xf32>
    %9 = vector.shape_cast %8 : vector<1x1x256xf32> to vector<1x256xf32>
    %cst = arith.constant dense<0.000000e+00> : vector<8x256xf32>
    %10 = tpu.matmul %3, %6, %cst {dimension_numbers = #tpu.dot_dimension_numbers<[1], [0], [0], [1], [0, 0, 1, 1], [], []>} : vector<8x128xf32>, vector<128x256xf32>, vector<8x256xf32> -> vector<8x256xf32>
    %11 = vector.broadcast %9 : vector<1x256xf32> to vector<8x256xf32>
    %12 = arith.addf %10, %11 : vector<8x256xf32>
    %13 = vector.extract_strided_slice %12 {offsets = [0, 0], sizes = [8, 128], strides = [1, 1]} : vector<8x256xf32> to vector<8x128xf32>
    %14 = arith.negf %13 : vector<8x128xf32>
    %15 = math.exp %14 : vector<8x128xf32>
    %cst_6 = arith.constant 1.000000e+00 : f32
    %16 = vector.broadcast %cst_6 : f32 to vector<8x128xf32>
    %17 = arith.addf %16, %15 : vector<8x128xf32>
    %18 = arith.divf %16, %17 : vector<8x128xf32>
    %19 = vector.extract_strided_slice %12 {offsets = [0, 128], sizes = [8, 128], strides = [1, 1]} : vector<8x256xf32> to vector<8x128xf32>
    %cst_7 = arith.constant 0.000000e+00 : f32
    %20 = vector.broadcast %cst_7 : f32 to vector<8x128xf32>
    %21 = arith.maximumf %19, %20 : vector<8x128xf32>
    %22 = arith.mulf %18, %21 : vector<8x128xf32>
    %cst_8 = arith.constant 1.000000e+00 : f32
    %23 = vector.broadcast %cst_8 : f32 to vector<8x128xf32>
    %24 = arith.subf %23, %18 : vector<8x128xf32>
    %25 = arith.mulf %24, %3 : vector<8x128xf32>
    %26 = arith.addf %22, %25 : vector<8x128xf32>
    %c0_9 = arith.constant 0 : index
    %c0_10 = arith.constant 0 : index
    %27 = vector.load %arg6[%c0_9, %c0_10] : memref<8x128xf32, #tpu.memory_space<vmem>>, vector<8x128xf32>
    tpu.vector_store %arg6[%c0_9, %c0_10], %26 {strides = array<i32>} : memref<8x128xf32, #tpu.memory_space<vmem>>, vector<8x128xf32>,
    %c1_i32 = arith.constant 1 : i32
    %28 = arith.cmpi eq, %arg1, %c1_i32 : i32
    %29 = arith.extui %28 : i1 to i32
    %c0_i32_11 = arith.constant 0 : i32
    %30 = arith.cmpi ne, %29, %c0_i32_11 : i32
    scf.if %30 {
      %c0_12 = arith.constant 0 : index
      %c0_13 = arith.constant 0 : index
      %31 = vector.load %arg6[%c0_12, %c0_13] : memref<8x128xf32, #tpu.memory_space<vmem>>, vector<8x128xf32>
      %c0_14 = arith.constant 0 : index
      %c0_15 = arith.constant 0 : index
      %32 = vector.load %arg5[%c0_14, %c0_15] : memref<8x128xf32, #tpu.memory_space<vmem>>, vector<8x128xf32>
      tpu.vector_store %arg5[%c0_14, %c0_15], %31 {strides = array<i32>} : memref<8x128xf32, #tpu.memory_space<vmem>>, vector<8x128xf32>,
    } else {
    }
    return
  }
  func.func @transform_0(%arg0: i32, %arg1: i32) -> (i32, i32) {
    %c0_i32 = arith.constant 0 : i32
    %c0_i32_0 = arith.constant 0 : i32
    return %arg0, %c0_i32 : i32, i32
  }
  func.func @transform_1(%arg0: i32, %arg1: i32) -> (i32, i32, i32) {
    %c0_i32 = arith.constant 0 : i32
    %c0_i32_0 = arith.constant 0 : i32
    %c0_i32_1 = arith.constant 0 : i32
    %c0_i32_2 = arith.constant 0 : i32
    return %c0_i32, %c0_i32_0, %c0_i32_1 : i32, i32, i32
  }
  func.func @transform_2(%arg0: i32, %arg1: i32) -> (i32, i32, i32) {
    %c0_i32 = arith.constant 0 : i32
    %c0_i32_0 = arith.constant 0 : i32
    %c0_i32_1 = arith.constant 0 : i32
    %c0_i32_2 = arith.constant 0 : i32
    return %c0_i32, %c0_i32_0, %c0_i32_1 : i32, i32, i32
  }
  func.func @transform_3(%arg0: i32, %arg1: i32) -> (i32, i32) {
    %c0_i32 = arith.constant 0 : i32
    %c0_i32_0 = arith.constant 0 : i32
    return %arg0, %c0_i32 : i32, i32
  }
}

</mosaic_0001>

<bundles_post_ra>
// kernel: highway_forward.1
= control target key start
LH: loop header
LB: loop body
LE: loop exit
PB: predicated region body
PF: predicated region fallthrough
CT: control target
= control target key end

     0   :  { %s1041_s0 = inlined_call_operand.hbm [shape: f32[16,128], index: 0, kind: input, shape index: {}]   ;;  %s1042_s1 = inlined_call_operand.hbm [shape: f32[2,128,256], index: 1, kind: input, shape index: {}]   ;;  %s1043_s2 = inlined_call_operand.hbm [shape: f32[2,1,256], index: 2, kind: input, shape index: {}]   ;;  %s1044_s3 = inlined_call_operand.hbm [shape: f32[16,128], index: 3, kind: output, shape index: {}]  }
   0x1   :  { %1045 = sst [smem:[#allocation13_spill]] %s1042_s1 }
   0x2   :  { %8 = vsyncpa [#allocation4], 0 }
   0x3   :  { %10 = vsyncpa [#allocation4 + $0x1], 0 }
   0x4   :  { %11 = vsyncpa [#allocation7], 0 }
   0x5   :  { %12 = vsyncpa [#allocation5], 0 }
   0x6   :  { %14 = vsyncpa [#allocation5 + $0x1], 0  ;;  %s825_s12 = smov 0   ;;  %s827_s13 = smov 0  }
   0x7   :  { %s829_s14 = smov 0   ;;  %s831_s15 = smov 0  }
   0x8   :  { %s833_s16 = smov 0   ;;  %s835_s17 = smov 0  }
   0x9   :  { %s837_s18 = smov 0   ;;  %s839_s19 = smov 0  }
   0xa LB: > { %s474_s20 = sadd.s32 4294967295, %s797_s19   ;;  %p476_p0 = scmp.ge.s32.totalorder %s797_s19, 1  ;;  %s797_s19 = sphi %s839_s19, %s20_s19   ;;  %s793_s18 = sphi %s837_s18, %s1059_s18   ;;  %s789_s17 = sphi %s835_s17, %s1058_s17   ;;  %s785_s16 = sphi %s833_s16, %s1057_s16   ;;  %s781_s15 = sphi %s831_s15, %s1056_s15   ;;  %s777_s14 = sphi %s829_s14, %s1055_s14   ;;  %s773_s13 = sphi %s827_s13, %s1054_s13   ;;  %s769_s12 = sphi %s825_s12, %s1053_s12  }
   0xb   : > { %p869_p1 = scmp.eq.s32.totalorder %s474_s20, 0  ;;  %p131_p2 = scmp.lt.s32.totalorder %s797_s19, 5 }
   0xc   : > { %s1047_s1 = sld [smem:[#allocation13_spill]]  ;;  %s799_s26 = smov [#allocation6]  }
   0xd   : > { %p877_p3 = pnand %p476_p0, %p131_p2  ;;  %s144_s27 = sshll.u32 %s799_s26, 4  ;;  %s145_s27 = int_to_ptr.vmem [resolvable:$true] %s144_s27 }
   0xe   : > { %s156_s30 = sshll.u32 %s1043_s2, 4  ;;  %s800_s4 = smov 256   ;;  %s157_s30 = int_to_ptr.hbm [resolvable:$true] %s156_s30 }
   0xf   : > { %p510_p4 = pneg %p877_p3  ;;  %s801_s5 = smov 16  }
  0x10   : > { %s802_s6 = smov [#allocation8]   ;;  %s803_s8 = smov 32  }
  0x11   : > { %p511_p5 = pnand %p510_p4, %p869_p1  ;;  %s158_s7 = sshll.u32 %s802_s6, 4  ;;  %s159_s7 = int_to_ptr.vmem [resolvable:$true] %s158_s7 }
  0x12   : > { %s142_s24 = sshll.u32 %s1047_s1, 4  ;;  %s804_s9 = smov 2   ;;  %s143_s24 = int_to_ptr.hbm [resolvable:$true] %s142_s24 }
  0x13   : > { %513 = dma.hbm_to_vmem [thread:$0]  (!%p511_p5), %s143_s24, 8192, %s145_s27, [#allocation7], %s800_s4, %s800_s4, %s801_s5  }
  0x14   : > { %516 = dma.hbm_to_vmem [thread:$0]  (!%p511_p5), %s157_s30, 64, %s159_s7, [#allocation7], %s803_s8, %s803_s8, %s804_s9  }
  0x15   : > { %s29_s10 = sadd.s32 1, %s789_s17  ;;  %s32_s11 = sadd.s32 1, %s793_s18 }
  0x16   : > { %p30_p6 = scmp.ge.s32.totalorder %s29_s10, 2  ;;  %s475_s22 = sadd.s32 4294967294, %s797_s19  }
  0x17   : > { %p46_p7 = scmp.ne.s32.totalorder %s777_s14, %s773_s13  ;;  %p47_p8 = scmp.eq.s32.totalorder %s797_s19, 0 }
  0x18   : > { %s1061_s10 = smov (%p30_p6, %s29_s10), 0  ;;  %s1063_s11 = smov (!%p30_p6, %s32_s11), %s793_s18 }
  0x19   : > { %p52_p9 = scmp.ne.s32.totalorder %s773_s13, %s769_s12  ;;  %p34_p10 = scmp.ge.s32.totalorder %s1063_s11, 2 }
  0x1a   : > { %p118_p11 = scmp.eq.s32.totalorder %s474_s20, 3  ;;  %s39_s23 = sadd.s32 1, %s777_s14 }
  0x1b   : > { %p904_p12 = por %p869_p1, %p52_p9  ;;  %s1065_s11 = smov (%p34_p10, %s1063_s11), 0 }
  0x1c   : > { %p913_p13 = por %p118_p11, %p46_p7  ;;  %p124_p0 = scmp.eq.s32.totalorder %s475_s22, 3 }
  0x1d   : > { %s36_s27 = ssub.s32 %s793_s18, %s1065_s11  ;;  %p922_p2 = por %p47_p8, %p46_p7 }
  0x1e   : > { %p37_p4 = scmp.eq.s32.totalorder %s36_s27, 0  ;;  %p926_p5 = por %p124_p0, %p52_p9 }
  0x1f   : > { %s172_s29 = sand.u32 1, %s777_s14   ;;  %s481_s30 = sshll.u32 %s793_s18, 3 }
  0x20   : > { %s933_s4 = scalar_select %p37_p4, %s777_s14, %s39_s23  }
  0x21   : > { %p527_p6 = scmp.lt.s32.totalorder %s797_s19, 4  ;;  %s480_s5 = sshll.u32 %s172_s29, 3 }
  0x22   : > { %s180_s8 = scalar_lea.hbm %s1041_s0, %s481_s30  ;;  %s176_s22 = scalar_lea.vmem [#allocation3], %s480_s5 }
  0x23   : > { %s182_s9 = sshll.u32 %s180_s8, 4  ;;  %s184_s1 = sshll.u32 %s176_s22, 4  ;;  %s183_s9 = int_to_ptr.hbm [resolvable:$true] %s182_s9  ;;  %s185_s1 = int_to_ptr.vmem [resolvable:$true] %s184_s1 }
  0x24   : > { %p518_p7 = pnand %p527_p6, %p922_p2  ;;  %s173_s27 = scalar_lea.sflag [#allocation4], %s172_s29 }
  0x25   : > { %193 = sbr.rel (%p877_p3) target bundleno = 274 (0x112), region = 32  ;;  %s944_s23 = sand.u32 (!%p877_p3), 1, %s773_s13  }
  0x26   : > { %520 = dma.hbm_to_vmem [thread:$0]  (!%p518_p7), %s183_s9, 128, %s185_s1, %s173_s27  }
  0x27   : > { %s483_s6 = sshll.u32 (!%p877_p3), %s944_s23, 3  ;;  %s196_s30 = scalar_lea.sflag (!%p877_p3), [#allocation4], %s944_s23 }
  0x28   : > { %s199_s7 = scalar_lea.vmem (!%p877_p3), [#allocation3], %s483_s6 }
  0x2a   : > { %756 = dma.done.wait (%p904_p12), %s196_s30, 128  }
  0x2b   : > { %758 = vsyncadd (%p904_p12), %s196_s30, 4294967168 }
  0x2c   : > { %760 = dma.done.wait (%p869_p1), [#allocation7], 8256  }
  0x2d   : > { %762 = vsyncadd (%p869_p1), [#allocation7], 4294959040  ;;  %s956_s1 = scalar_lea.vmem [#allocation9], %s483_s6  ;;  %p487_p3 = scmp.ne.s32.totalorder %s781_s15, 0 }
  0x2f   : > { %236 = sbr.rel (%p487_p3) target bundleno = 54 (0x36), region = 48 }
  0x34   : > { %v237_v0 = vld [vmem:[%s199_s7] sm:$0xff] }
  0x35   : > { %238 = vst [vmem:[#allocation2] sm:$0xff] %v237_v0 }
  0x36 PF: > { %s497_s25 = sshll.u32 %s781_s15, 8  ;;  %s490_s21 = sshll.u32 %s781_s15, 1 }
  0x37   : > { %s960_s28 = scalar_lea.vmem [#allocation6], %s497_s25  ;;  %s276_s24 = scalar_lea.vmem [#allocation8], %s490_s21 }
  0x38   : > { %v273_v1 = vld [vmem:[%s960_s28 + $0xf0] sm:$0xff]  ;;  %v271_v2 = vld [vmem:[%s960_s28 + $0xe0] sm:$0xff]  ;;  %v274_v5 = vld [vmem:[%s960_s28 + $0xf8] sm:$0xff]  ;;  %p492_p1 = scmp.ne.s32.totalorder %s781_s15, 1 }
  0x39   : > { %283 = vmatpush.msra.mxu0 %v273_v1  ;;  %v269_v3 = vld [vmem:[%s960_s28 + $0xd0] sm:$0xff]  ;;  %v267_v4 = vld [vmem:[%s960_s28 + $0xc0] sm:$0xff]  ;;  %303 = vmatpush.msra.mxu1 %v274_v5  ;;  %v272_v6 = vld [vmem:[%s960_s28 + $0xe8] sm:$0xff] }
  0x3a   : > { %v265_v7 = vld [vmem:[%s960_s28 + $0xb0] sm:$0xff]  ;;  %v270_v8 = vld [vmem:[%s960_s28 + $0xd8] sm:$0xff]  ;;  %v263_v9 = vld [vmem:[%s960_s28 + $0xa0] sm:$0xff] }
  0x3b   : > { %284 = vmatpush.msra.mxu0 %v271_v2  ;;  %304 = vmatpush.msra.mxu1 %v272_v6  ;;  %v268_v10 = vld [vmem:[%s960_s28 + $0xc8] sm:$0xff]  ;;  %v261_v11 = vld [vmem:[%s960_s28 + $0x90] sm:$0xff]  ;;  %v266_v12 = vld [vmem:[%s960_s28 + $0xb8] sm:$0xff] }
  0x3c   : > { %v259_v13 = vld [vmem:[%s960_s28 + $0x80] sm:$0xff]  ;;  %v264_v14 = vld [vmem:[%s960_s28 + $0xa8] sm:$0xff]  ;;  %v257_v15 = vld [vmem:[%s960_s28 + $0x70] sm:$0xff] }
  0x3d   : > { %285 = vmatpush.msra.mxu0 %v269_v3  ;;  %305 = vmatpush.msra.mxu1 %v270_v8  ;;  %v262_v16 = vld [vmem:[%s960_s28 + $0x98] sm:$0xff]  ;;  %v255_v17 = vld [vmem:[%s960_s28 + $0x60] sm:$0xff]  ;;  %v260_v18 = vld [vmem:[%s960_s28 + $0x88] sm:$0xff] }
  0x3e   : > { %v253_v19 = vld [vmem:[%s960_s28 + $0x50] sm:$0xff]  ;;  %v258_v20 = vld [vmem:[%s960_s28 + $0x78] sm:$0xff]  ;;  %v251_v21 = vld [vmem:[%s960_s28 + $0x40] sm:$0xff] }
  0x3f   : > { %286 = vmatpush.msra.mxu0 %v267_v4  ;;  %306 = vmatpush.msra.mxu1 %v268_v10  ;;  %v256_v22 = vld [vmem:[%s960_s28 + $0x68] sm:$0xff]  ;;  %v249_v23 = vld [vmem:[%s960_s28 + $0x30] sm:$0xff]  ;;  %v254_v24 = vld [vmem:[%s960_s28 + $0x58] sm:$0xff] }
  0x40   : > { %v247_v25 = vld [vmem:[%s960_s28 + $0x20] sm:$0xff]  ;;  %v252_v26 = vld [vmem:[%s960_s28 + $0x48] sm:$0xff]  ;;  %v245_v27 = vld [vmem:[%s960_s28 + $0x10] sm:$0xff] }
  0x41   : > { %287 = vmatpush.msra.mxu0 %v265_v7  ;;  %307 = vmatpush.msra.mxu1 %v266_v12  ;;  %v250_v28 = vld [vmem:[%s960_s28 + $0x38] sm:$0xff]  ;;  %v243_v29 = vld [vmem:[%s960_s28] sm:$0xff]  ;;  %v248_v30 = vld [vmem:[%s960_s28 + $0x28] sm:$0xff] }
  0x42   : > { %v239_v31 = vld [vmem:[#allocation2] sm:$0xff]  ;;  %v246_v32 = vld [vmem:[%s960_s28 + $0x18] sm:$0xff]  ;;  %v244_v33 = vld [vmem:[%s960_s28 + $0x8] sm:$0xff] }
  0x43   : > { %288 = vmatpush.msra.mxu0 %v263_v9  ;;  %308 = vmatpush.msra.mxu1 %v264_v14  ;;  %v277_v34 = vld [vmem:[%s276_s24] sm:$0x3] }
  0x44   : > { %v279_v35 = vperm.slane %v277_v34, 0  ;;  %v280_v42 = vperm.slane %v277_v34, 1 }
  0x45   : > { %289 = vmatpush.msra.mxu0 %v261_v11  ;;  %309 = vmatpush.msra.mxu1 %v262_v16 }
  0x47   : > { %290 = vmatpush.msra.mxu0 %v259_v13  ;;  %310 = vmatpush.msra.mxu1 %v260_v18 }
  0x49   : > { %291 = vmatpush.msra.mxu0 %v257_v15  ;;  %311 = vmatpush.msra.mxu1 %v258_v20 }
  0x4b   : > { %292 = vmatpush.msra.mxu0 %v255_v17  ;;  %312 = vmatpush.msra.mxu1 %v256_v22 }
  0x4d   : > { %293 = vmatpush.msra.mxu0 %v253_v19  ;;  %313 = vmatpush.msra.mxu1 %v254_v24 }
  0x4f   : > { %294 = vmatpush.msra.mxu0 %v251_v21  ;;  %314 = vmatpush.msra.mxu1 %v252_v26 }
  0x51   : > { %295 = vmatpush.msra.mxu0 %v249_v23  ;;  %315 = vmatpush.msra.mxu1 %v250_v28 }
  0x53   : > { %296 = vmatpush.msra.mxu0 %v247_v25  ;;  %316 = vmatpush.msra.mxu1 %v248_v30 }
  0x55   : > { %297 = vmatpush.msra.mxu0 %v245_v27  ;;  %317 = vmatpush.msra.mxu1 %v246_v32 }
  0x57   : > { %298 = vmatpush.msra.mxu0 %v243_v29  ;;  %318 = vmatpush.msra.mxu1 %v244_v33 }
  0x58   : > { %299 = vmatmul.f32.vlgmr.msra.gmra.mxu0 %v239_v31  ;;  %319 = vmatmul.f32.vlgmr.msra.gmra.mxu1 %v239_v31 }
  0xd5   : > { %v300_v36 = vpop.f32.mrf.mxu0  ;;  %v320_v44 = vpop.f32.mrf.mxu1 }
  0xd6   : > { %v301_v37 = vadd.f32 %v300_v36, %v279_v35  ;;  %v321_v47 = vadd.f32 %v320_v44, %v280_v42 }
  0xd8   : > { %v491_v38 = vmul.f32 -1.442695, %v301_v37  ;;  %v342_v53 = vmax.f32 %v321_v47, 0.0 }
  0xda   : > { %601 = vpow2.f32 %v491_v38 }
  0xe0   : > { %v602_v39 = vpop.eup %601 }
  0xe1   : > { %v326_v40 = vadd.f32 1.0, %v602_v39 }
  0xe3   : > { %603 = vrcp.f32 %v326_v40  ;;  %v338_v46 = vand.u32 2147483648, %v326_v40  ;;  %v336_v49 = vand.u32 2147483647, %v326_v40  ;;  %vm332_vm1 = vweird.f32 %v326_v40 }
  0xe5   : > { %v339_v51 = vor.u32 1.1754944e-38, %v338_v46  ;;  %vm337_vm3 = vcmp.eq.f32.partialorder %v336_v49, 8.507059e+37 }
  0xe9   : > { %v604_v41 = vpop.eup %603 }
  0xea   : > { %v328_v43 = vmul.f32 %v604_v41, %v326_v40  ;;  %vm333_vm0 = vweird.f32 %v604_v41 }
  0xeb   : > { %vm334_vm2 = vmor %vm332_vm1, %vm333_vm0 }
  0xec   : > { %v329_v45 = vsub.f32 1.0, %v328_v43 }
  0xee   : > { %v330_v48 = vmul.f32 %v604_v41, %v329_v45 }
  0xf0   : > { %v331_v50 = vadd.f32 %v604_v41, %v330_v48 }
  0xf2   : > { %v335_v52 = vsel %vm334_vm2, %v604_v41, %v331_v50 }
  0xf3   : > { %v340_v54 = vsel %vm337_vm3, %v339_v51, %v335_v52 }
  0xf4   : > { %v344_v55 = vsub.f32 1.0, %v340_v54  ;;  %v343_v56 = vmul.f32 %v342_v53, %v340_v54 }
  0xf6   : > { %v345_v57 = vmul.f32 %v344_v55, %v239_v31  ;;  %351 = sbr.rel (%p492_p1) target bundleno = 259 (0x103), region = 52 }
  0xf8   : > { %v346_v58 = vadd.f32 %v345_v57, %v343_v56 }
  0xfa   : > { %347 = vst [vmem:[#allocation2] sm:$0xff] %v346_v58 }
 0x101   : > { %v352_v59 = vld [vmem:[#allocation2] sm:$0xff] }
 0x102   : > { %353 = vst [vmem:[%s956_s1] sm:$0xff] %v352_v59 }
 0x103 PF: > { %s494_s29 = sshll.u32 %s785_s16, 3  ;;  %s367_s22 = sshll.u32 %s956_s1, 4  ;;  %s368_s22 = int_to_ptr.vmem [resolvable:$true] %s367_s22 }
 0x104   : > { %s365_s9 = scalar_lea.hbm %s1044_s3, %s494_s29  ;;  %s355_s6 = scalar_lea.sflag [#allocation5], %s944_s23 }
 0x105   : > { %s369_s27 = sshll.u32 %s365_s9, 4  ;;  %s715_s16 = scalar_lea.hbm %s1044_s3, 16  ;;  %s370_s27 = int_to_ptr.hbm [resolvable:$true] %s369_s27 }
 0x106   : > { %s709_s15 = sshra.s32 %s370_s27, 4  ;;  %s710_s15 = int_to_ptr.hbm [resolvable:$true] %s709_s15 }
 0x107   : > { %s711_s30 = scalar_lea.hbm %s710_s15, 8  ;;  %p716_p11 = scmp.lt.s32.totalorder %s710_s15, %s1044_s3 }
 0x108   : > { %p712_p8 = scmp.ne.s32.totalorder %s710_s15, %s711_s30  ;;  %p717_p12 = scmp.lt.s32.totalorder %s715_s16, %s711_s30 }
 0x10a   : > { %p713_p9 = pnand %p712_p8, %p913_p13  ;;  %p718_p0 = por %p717_p12, %p716_p11 }
 0x10c   : > { %p714_p10 = pneg %p713_p9 }
 0x10e   : > { %p719_p2 = pnand %p718_p0, %p714_p10 }
 0x110   : > { %722 = shalt.err (!%p719_p2)
}
 0x111   : > { %508 = dma.vmem_to_hbm [thread:$0]  (%p913_p13), %s368_s22, 128, %s370_s27, %s355_s6  }
 0x112 PF: > { %p530_p4 = scmp.ge.s32.totalorder %s797_s19, 2  ;;  %s381_s23 = sand.u32 1, %s769_s12  }
 0x113   : > { %s382_s1 = scalar_lea.sflag [#allocation5], %s381_s23 }
 0x114   : > { %p522_p6 = pnand %p530_p4, %p926_p5 }
 0x116   : > { %p523_p7 = pneg %p522_p6 }
 0x118   : > { %764 = dma.done.wait (%p523_p7), %s382_s1, 128  }
 0x119   : > { %766 = vsyncadd (%p523_p7), %s382_s1, 4294967168  ;;  %s20_s19 = sadd.s32 1, %s797_s19   ;;  %s1053_s12 = smov %s773_s13 }
 0x11a   : > { %p17_p3 = scmp.ge.s32.totalorder %s20_s19, 6   ;;  %s1054_s13 = smov %s777_s14 }
 0x11b   : > { %s1055_s14 = smov %s933_s4  ;;  %s1056_s15 = smov %s789_s17 }
 0x11c   : > { %s1057_s16 = smov %s793_s18  ;;  %s1058_s17 = smov %s1061_s10 }
 0x11d   : > { %s1059_s18 = smov %s1065_s11  ;;  %19 = sbr.rel (!%p17_p3) target bundleno = 10 (0xa), region = 95 }
 0x122   :  { %388 = vsyncpa [#allocation4], 1 }
 0x123   :  { %390 = vsyncpa [#allocation4 + $0x1], 1 }
 0x124   :  { %391 = vsyncpa [#allocation7], 1 }
 0x125   :  { %392 = vsyncpa [#allocation5], 1 }
 0x126   :  { %394 = vsyncpa [#allocation5 + $0x1], 1 }

</bundles_post_ra>
